<compile_context>
chip_gen: v7x
topology: tpu7x:2x2x1
jax: 0.10.0
libtpu: 0.0.40
codegen_flags: <defaults>
</compile_context>

<pallas_src>
import jax
import jax.numpy as jnp
from jax.experimental import pallas as pl
from jax.experimental.pallas import tpu as pltpu

NEG_SLOPE = 0.01  # PyTorch nn.LeakyReLU() default


def _leaky(y):
    return jnp.where(y > 0, y, NEG_SLOPE * y)


def _dot(a, b):
    return jnp.dot(a, b, preferred_element_type=jnp.float32)


# --------------------------- fused Pallas kernel ----------------------------
#
# Shapes (input_dim C=14, seq len L=30):
#   conv1 (k3,s2,p1,d1):  L=30 -> 15
#   enc1 conv2 (k3,s2,p1,d4): 15 -> 5 ; MaxPool(5) -> 1
#   enc2 conv2 (k5,s2,p1,d2): 15 -> 5 ; MaxPool(5) -> 1
#   enc3 conv2 (k7,s2,p1,d1): 15 -> 6 ; MaxPool(6) -> 1
#   concat -> (B,14,3) -> flatten 42 -> Linear(42,64)
#
# lhs (built index-only in the wrapper): row = [xpad[2t] | xpad[2t+1] | xpad[2t+2]]
#   rows 0..8B-1   : even output positions t=0,2,...,14 (batch-major, 8/batch)
#   rows 8B..16B-1 : odd  output positions t=1,3,...,13 (7/batch + 1 junk row)
#
# conv2 reads hpad (len 17, zero-padded) split by parity:
#   hpad_even = [0, h@odd t, 0, ...]  (slab, 16 rows/batch, zero elsewhere)
#   hpad_odd  = [h@even t, 0, ...]
# so every conv2 tap of every encoder is a contiguous static slice of one slab:
#   slice s of hpad_even carries enc1 tap s/2 (s=0,2,4), enc2 tap s, enc3 tap 2s (s<=3)
#   slice r of hpad_odd  carries enc3 tap 2r+1 (r=0..2)

def generator2_fused_kernel(lhs_ref, w1_ref, b1_ref, w2e_ref, w2o_ref, b2_ref,
                            perm_ref, linw_ref, linb_ref,
                            feat_ref, hint_ref, hpe_ref, hpo_ref):
    B = feat_ref.shape[0]
    threeC = w1_ref.shape[0]
    C = threeC // 3
    Mo = 16 * B - 8          # accumulator rows; batch b lives at rows 16b..16b+5

    # ---- conv1 for all taps / encoders / batches / phases: ONE dot ---------
    h_all = _leaky(_dot(lhs_ref[...], w1_ref[...]) + b1_ref[...])    # (16B, 3C)

    # ---- scatter into zero-padded phase-split conv2 input slabs ------------
    hpe_ref[...] = jnp.zeros(hpe_ref.shape, jnp.float32)
    hpo_ref[...] = jnp.zeros(hpo_ref.shape, jnp.float32)
    for b in range(B):                                   # static unroll (B=2)
        hpo_ref[16 * b:16 * b + 8, :] = h_all[8 * b:8 * b + 8, :]
        hpe_ref[16 * b + 1:16 * b + 8, :] = \
            h_all[8 * B + 8 * b:8 * B + 8 * b + 7, :]

    # ---- conv2 for all three encoders: 8 dots into one accumulator ---------
    y = _dot(hpe_ref[0:Mo, :], w2e_ref[0])
    for s in range(1, 5):
        y = y + _dot(hpe_ref[s:s + Mo, :], w2e_ref[s])
    for r in range(3):
        y = y + _dot(hpo_ref[r:r + Mo, :], w2o_ref[r])
    z = _leaky(y + b2_ref[...])                                       # (Mo, 3C)

    # ---- fused bias + LeakyReLU + MaxPool (5 / 5 / 6 per encoder) ----------
    lane = jax.lax.broadcasted_iota(jnp.int32, (1, threeC), 1)
    rows = []
    for b in range(B):
        zb = z[16 * b:16 * b + 6, :]
        m5 = jnp.max(zb[0:5, :], axis=0, keepdims=True)   # enc1 / enc2 pool(5)
        m6 = jnp.maximum(m5, zb[5:6, :])                  # enc3 pool(6)
        rows.append(jnp.where(lane >= 2 * C, m6, m5))
    feats = jnp.concatenate(rows, axis=0)                 # (B, 3C) encoder-major

    # ---- outputs: torch-order features + adapter hint (perm folded in linw) -
    feat_ref[...] = _dot(feats, perm_ref[...])                        # (B, 42)
    hint_ref[...] = _dot(feats, linw_ref[...]) + linb_ref[...]        # (B, 64)


# ----------------------- one-time parameter preparation ---------------------

def prepare_params(params):
    C = params["e1_b1"].shape[0]
    threeC = 3 * C

    def taps(w):   # torch conv weight (Cout, Cin, k) -> (k, Cin, Cout)
        return jnp.transpose(w, (2, 1, 0)).astype(jnp.float32)

    # conv1: taps stacked on K (rows), encoders stacked on N (cols)
    w1 = jnp.concatenate([taps(params["e1_w1"]).reshape(3 * C, C),
                          taps(params["e2_w1"]).reshape(3 * C, C),
                          taps(params["e3_w1"]).reshape(3 * C, C)], axis=1)
    b1 = jnp.concatenate([params["e1_b1"], params["e2_b1"],
                          params["e3_b1"]])[None, :].astype(jnp.float32)

    e1t = taps(params["e1_w2"])   # (3, C, C)
    e2t = taps(params["e2_w2"])   # (5, C, C)
    e3t = taps(params["e3_w2"])   # (7, C, C)

    # conv2 weights grouped by shared lhs slice, block-diagonal per encoder
    w2e = jnp.zeros((5, threeC, threeC), jnp.float32)
    for s in range(5):
        if s % 2 == 0:
            w2e = w2e.at[s, 0:C, 0:C].set(e1t[s // 2])            # enc1 tap s/2
        w2e = w2e.at[s, C:2 * C, C:2 * C].set(e2t[s])             # enc2 tap s
        if s <= 3:
            w2e = w2e.at[s, 2 * C:3 * C, 2 * C:3 * C].set(e3t[2 * s])  # enc3 even
    w2o = jnp.zeros((3, threeC, threeC), jnp.float32)
    for r in range(3):
        w2o = w2o.at[r, 2 * C:3 * C, 2 * C:3 * C].set(e3t[2 * r + 1])  # enc3 odd
    b2 = jnp.concatenate([params["e1_b2"], params["e2_b2"],
                          params["e3_b2"]])[None, :].astype(jnp.float32)

    # e-major (e*C + c) -> torch flatten (c*3 + e) permutation; folded into the
    # adapter weight so `hint` does not serialize behind the permutation.
    i = jnp.arange(threeC)
    perm = jax.nn.one_hot((i % C) * 3 + i // C, threeC, dtype=jnp.float32)
    linw_perm = jnp.dot(perm, params["lin_w"].T.astype(jnp.float32))   # (42, 64)
    linb = params["lin_b"][None, :].astype(jnp.float32)

    return {"w1": w1, "b1": b1, "w2e": w2e, "w2o": w2o, "b2": b2,
            "perm": perm, "linw_perm": linw_perm, "linb": linb}


# ------------------------------ JAX wrapper ---------------------------------

def generator2_forward(src, prep):
    B, C, L = src.shape
    assert C == 14 and L == 30, "Generator_2 adapter expects flatten size 42"
    threeC = 3 * C

    # Per-call work = ONE index-only im2col relayout (single fused producer):
    #   xim[b, r, :] = [xpad[b, r] | xpad[b, r+1] | xpad[b, r+2]]
    # TODO(synk): could be folded into the kernel's input DMA via
    # compiler_params allow_input_fusion once validated on all targets.
    xpad = jnp.pad(src, ((0, 0), (0, 0), (1, 1)))            # (B, C, 32)
    xpos = jnp.transpose(xpad, (0, 2, 1))                    # (B, 32, C)
    x1 = jnp.pad(xpos[:, 1:, :], ((0, 0), (0, 1), (0, 0)))
    x2 = jnp.pad(xpos[:, 2:, :], ((0, 0), (0, 2), (0, 0)))
    xim = jnp.concatenate([xpos, x1, x2], axis=-1)           # (B, 32, 3C)
    xim4 = xim.reshape(B, 8, 4, threeC)
    lhs = jnp.concatenate([xim4[:, :, 0, :].reshape(8 * B, threeC),   # even t
                           xim4[:, :, 2, :].reshape(8 * B, threeC)],  # odd t
                          axis=0)                            # (16B, 3C)

    vmem = pl.BlockSpec(memory_space=pltpu.MemorySpace.VMEM)
    feats, hint = pl.pallas_call(
        generator2_fused_kernel,
        out_shape=(jax.ShapeDtypeStruct((B, threeC), jnp.float32),
                   jax.ShapeDtypeStruct((B, 64), jnp.float32)),
        in_specs=[vmem] * 9,
        out_specs=(vmem, vmem),
        scratch_shapes=[pltpu.VMEM((16 * B, threeC), jnp.float32),   # hpad_even
                        pltpu.VMEM((16 * B, threeC), jnp.float32)],  # hpad_odd
    )(lhs, prep["w1"], prep["b1"], prep["w2e"], prep["w2o"], prep["b2"],
      prep["perm"], prep["linw_perm"], prep["linb"])
    return feats, hint


# --------------------------- pure-JAX reference -----------------------------

def _ref_forward(src, params):
    hi = jax.lax.Precision.HIGHEST

    def conv1d(x, w, b, s, p, d):
        y = jax.lax.conv_general_dilated(
            x, w, window_strides=(s,), padding=[(p, p)], rhs_dilation=(d,),
            dimension_numbers=("NCH", "OIH", "NCH"), precision=hi)
        return y + b[None, :, None]

    def encoder(x, w1, b1, w2, b2, d2, pool):
        h = _leaky(conv1d(x, w1, b1, 2, 1, 1))
        y = _leaky(conv1d(h, w2, b2, 2, 1, d2))
        B, C, Lo = y.shape
        lp = Lo // pool
        return y[:, :, :lp * pool].reshape(B, C, lp, pool).max(axis=-1)

    f1 = encoder(src, params["e1_w1"], params["e1_b1"],
                 params["e1_w2"], params["e1_b2"], 4, 5)
    f2 = encoder(src, params["e2_w1"], params["e2_b1"],
                 params["e2_w2"], params["e2_b2"], 2, 5)
    f3 = encoder(src, params["e3_w1"], params["e3_b1"],
                 params["e3_w2"], params["e3_b2"], 1, 6)
    feats = jnp.concatenate([f1, f2, f3], axis=2).reshape(src.shape[0], -1)
    hint = jnp.dot(feats, params["lin_w"].T, precision=hi) + params["lin_b"]
    return feats, hint


# ---------------------------------- main -------------------------------------

def _conv_params(key, C, k):
    k1, k2 = jax.random.split(key)
    bound = 1.0 / jnp.sqrt(C * k)
    w = jax.random.uniform(k1, (C, C, k), jnp.float32, -bound, bound)
    b = jax.random.uniform(k2, (C,), jnp.float32, -bound, bound)
    return w, b


if __name__ == "__main__":
    B, C, L = 2, 14, 30   # input_dim=14, seq len 30 -> flatten size 14*3 = 42

    root = jax.random.PRNGKey(0)
    keys = jax.random.split(root, 9)
    src = jax.random.normal(keys[0], (B, C, L), jnp.float32)

    params = {}
    params["e1_w1"], params["e1_b1"] = _conv_params(keys[1], C, 3)
    params["e1_w2"], params["e1_b2"] = _conv_params(keys[2], C, 3)
    params["e2_w1"], params["e2_b1"] = _conv_params(keys[3], C, 3)
    params["e2_w2"], params["e2_b2"] = _conv_params(keys[4], C, 5)
    params["e3_w1"], params["e3_b1"] = _conv_params(keys[5], C, 3)
    params["e3_w2"], params["e3_b2"] = _conv_params(keys[6], C, 7)
    lin_bound = 1.0 / jnp.sqrt(42.0)
    params["lin_w"] = jax.random.uniform(keys[7], (64, 42), jnp.float32,
                                         -lin_bound, lin_bound)
    params["lin_b"] = jax.random.uniform(keys[8], (64,), jnp.float32,
                                         -lin_bound, lin_bound)

    # one-time weight preparation (hoisted off the per-call hot path)
    prep = jax.tree_util.tree_map(jnp.asarray, prepare_params(params))

    fwd = jax.jit(generator2_forward)
    features, hint = fwd(src, prep)
    jax.block_until_ready((features, hint))

    assert features.shape == (B, 42), features.shape
    assert hint.shape == (B, 64), hint.shape

    # correctness check against a pure-JAX (XLA conv) reference
    ref_feats, ref_hint = _ref_forward(src, params)
    assert jnp.allclose(features, ref_feats, rtol=5e-3, atol=5e-3), (
        float(jnp.max(jnp.abs(features - ref_feats))))
    assert jnp.allclose(hint, ref_hint, rtol=5e-3, atol=5e-3), (
        float(jnp.max(jnp.abs(hint - ref_hint))))

    print("KERNEL_OK")
</pallas_src>

<mosaic_0001>
module attributes {stable_mosaic.version = 11 : i64} {
  func.func @generator2_fused_kernel(%arg0: memref<32x42xf32, #tpu.memory_space<vmem>>, %arg1: memref<42x42xf32, #tpu.memory_space<vmem>>, %arg2: memref<1x42xf32, #tpu.memory_space<vmem>>, %arg3: memref<5x42x42xf32, #tpu.memory_space<vmem>>, %arg4: memref<3x42x42xf32, #tpu.memory_space<vmem>>, %arg5: memref<1x42xf32, #tpu.memory_space<vmem>>, %arg6: memref<42x42xf32, #tpu.memory_space<vmem>>, %arg7: memref<42x64xf32, #tpu.memory_space<vmem>>, %arg8: memref<1x64xf32, #tpu.memory_space<vmem>>, %arg9: memref<2x42xf32, #tpu.memory_space<vmem>>, %arg10: memref<2x64xf32, #tpu.memory_space<vmem>>, %arg11: memref<32x42xf32, #tpu.memory_space<vmem>>, %arg12: memref<32x42xf32, #tpu.memory_space<vmem>>) attributes {dimension_semantics = [], scalar_prefetch = 0 : i64, scratch_operands = 2 : i64, tpu.core_type = #tpu.core_type<tc>} {
    %c0 = arith.constant 0 : index
    %c0_0 = arith.constant 0 : index
    %0 = vector.load %arg0[%c0, %c0_0] : memref<32x42xf32, #tpu.memory_space<vmem>>, vector<32x42xf32>
    %c0_1 = arith.constant 0 : index
    %c0_2 = arith.constant 0 : index
    %1 = vector.load %arg1[%c0_1, %c0_2] : memref<42x42xf32, #tpu.memory_space<vmem>>, vector<42x42xf32>
    %cst = arith.constant dense<0.000000e+00> : vector<32x42xf32>
    %2 = tpu.matmul %0, %1, %cst {dimension_numbers = #tpu.dot_dimension_numbers<[1], [0], [0], [1], [0, 0, 1, 1], [], []>} : vector<32x42xf32>, vector<42x42xf32>, vector<32x42xf32> -> vector<32x42xf32>
    %c0_3 = arith.constant 0 : index
    %c0_4 = arith.constant 0 : index
    %3 = vector.load %arg2[%c0_3, %c0_4] : memref<1x42xf32, #tpu.memory_space<vmem>>, vector<1x42xf32>
    %4 = vector.broadcast %3 : vector<1x42xf32> to vector<32x42xf32>
    %5 = arith.addf %2, %4 : vector<32x42xf32>
    %cst_5 = arith.constant 0.000000e+00 : f32
    %6 = vector.broadcast %cst_5 : f32 to vector<32x42xf32>
    %7 = arith.cmpf ogt, %5, %6 : vector<32x42xf32>
    %cst_6 = arith.constant 0.00999999977 : f32
    %8 = vector.broadcast %cst_6 : f32 to vector<32x42xf32>
    %9 = arith.mulf %8, %5 : vector<32x42xf32>
    %10 = arith.select %7, %5, %9 : vector<32x42xi1>, vector<32x42xf32>
    %cst_7 = arith.constant 0.000000e+00 : f32
    %11 = vector.broadcast %cst_7 : f32 to vector<32x42xf32>
    %c0_8 = arith.constant 0 : index
    %c0_9 = arith.constant 0 : index
    %12 = vector.load %arg11[%c0_8, %c0_9] : memref<32x42xf32, #tpu.memory_space<vmem>>, vector<32x42xf32>
    tpu.vector_store %arg11[%c0_8, %c0_9], %11 {strides = array<i32>} : memref<32x42xf32, #tpu.memory_space<vmem>>, vector<32x42xf32>,
    %cst_10 = arith.constant 0.000000e+00 : f32
    %13 = vector.broadcast %cst_10 : f32 to vector<32x42xf32>
    %c0_11 = arith.constant 0 : index
    %c0_12 = arith.constant 0 : index
    %14 = vector.load %arg12[%c0_11, %c0_12] : memref<32x42xf32, #tpu.memory_space<vmem>>, vector<32x42xf32>
    tpu.vector_store %arg12[%c0_11, %c0_12], %13 {strides = array<i32>} : memref<32x42xf32, #tpu.memory_space<vmem>>, vector<32x42xf32>,
    %15 = vector.extract_strided_slice %10 {offsets = [0, 0], sizes = [8, 42], strides = [1, 1]} : vector<32x42xf32> to vector<8x42xf32>
    %c0_13 = arith.constant 0 : index
    %c0_14 = arith.constant 0 : index
    %16 = vector.load %arg12[%c0_13, %c0_14] : memref<32x42xf32, #tpu.memory_space<vmem>>, vector<8x42xf32>
    tpu.vector_store %arg12[%c0_13, %c0_14], %15 {strides = array<i32>} : memref<32x42xf32, #tpu.memory_space<vmem>>, vector<8x42xf32>,
    %17 = vector.extract_strided_slice %10 {offsets = [16, 0], sizes = [7, 42], strides = [1, 1]} : vector<32x42xf32> to vector<7x42xf32>
    %c1 = arith.constant 1 : index
    %c0_15 = arith.constant 0 : index
    %18 = vector.load %arg11[%c1, %c0_15] : memref<32x42xf32, #tpu.memory_space<vmem>>, vector<7x42xf32>
    tpu.vector_store %arg11[%c1, %c0_15], %17 {strides = array<i32>} : memref<32x42xf32, #tpu.memory_space<vmem>>, vector<7x42xf32>,
    %19 = vector.extract_strided_slice %10 {offsets = [8, 0], sizes = [8, 42], strides = [1, 1]} : vector<32x42xf32> to vector<8x42xf32>
    %c16 = arith.constant 16 : index
    %c0_16 = arith.constant 0 : index
    %20 = vector.load %arg12[%c16, %c0_16] : memref<32x42xf32, #tpu.memory_space<vmem>>, vector<8x42xf32>
    tpu.vector_store %arg12[%c16, %c0_16], %19 {strides = array<i32>} : memref<32x42xf32, #tpu.memory_space<vmem>>, vector<8x42xf32>,
    %21 = vector.extract_strided_slice %10 {offsets = [24, 0], sizes = [7, 42], strides = [1, 1]} : vector<32x42xf32> to vector<7x42xf32>
    %c17 = arith.constant 17 : index
    %c0_17 = arith.constant 0 : index
    %22 = vector.load %arg11[%c17, %c0_17] : memref<32x42xf32, #tpu.memory_space<vmem>>, vector<7x42xf32>
    tpu.vector_store %arg11[%c17, %c0_17], %21 {strides = array<i32>} : memref<32x42xf32, #tpu.memory_space<vmem>>, vector<7x42xf32>,
    %c0_18 = arith.constant 0 : index
    %c0_19 = arith.constant 0 : index
    %23 = vector.load %arg11[%c0_18, %c0_19] : memref<32x42xf32, #tpu.memory_space<vmem>>, vector<24x42xf32>
    %c0_20 = arith.constant 0 : index
    %c0_21 = arith.constant 0 : index
    %c0_22 = arith.constant 0 : index
    %24 = vector.load %arg3[%c0_20, %c0_21, %c0_22] : memref<5x42x42xf32, #tpu.memory_space<vmem>>, vector<1x42x42xf32>
    %25 = vector.shape_cast %24 : vector<1x42x42xf32> to vector<42x42xf32>
    %cst_23 = arith.constant dense<0.000000e+00> : vector<24x42xf32>
    %26 = tpu.matmul %23, %25, %cst_23 {dimension_numbers = #tpu.dot_dimension_numbers<[1], [0], [0], [1], [0, 0, 1, 1], [], []>} : vector<24x42xf32>, vector<42x42xf32>, vector<24x42xf32> -> vector<24x42xf32>
    %c1_24 = arith.constant 1 : index
    %c0_25 = arith.constant 0 : index
    %27 = vector.load %arg11[%c1_24, %c0_25] : memref<32x42xf32, #tpu.memory_space<vmem>>, vector<24x42xf32>
    %c1_26 = arith.constant 1 : index
    %c0_27 = arith.constant 0 : index
    %c0_28 = arith.constant 0 : index
    %28 = vector.load %arg3[%c1_26, %c0_27, %c0_28] : memref<5x42x42xf32, #tpu.memory_space<vmem>>, vector<1x42x42xf32>
    %29 = vector.shape_cast %28 : vector<1x42x42xf32> to vector<42x42xf32>
    %cst_29 = arith.constant dense<0.000000e+00> : vector<24x42xf32>
    %30 = tpu.matmul %27, %29, %cst_29 {dimension_numbers = #tpu.dot_dimension_numbers<[1], [0], [0], [1], [0, 0, 1, 1], [], []>} : vector<24x42xf32>, vector<42x42xf32>, vector<24x42xf32> -> vector<24x42xf32>
    %31 = arith.addf %26, %30 : vector<24x42xf32>
    %c2 = arith.constant 2 : index
    %c0_30 = arith.constant 0 : index
    %32 = vector.load %arg11[%c2, %c0_30] : memref<32x42xf32, #tpu.memory_space<vmem>>, vector<24x42xf32>
    %c2_31 = arith.constant 2 : index
    %c0_32 = arith.constant 0 : index
    %c0_33 = arith.constant 0 : index
    %33 = vector.load %arg3[%c2_31, %c0_32, %c0_33] : memref<5x42x42xf32, #tpu.memory_space<vmem>>, vector<1x42x42xf32>
    %34 = vector.shape_cast %33 : vector<1x42x42xf32> to vector<42x42xf32>
    %cst_34 = arith.constant dense<0.000000e+00> : vector<24x42xf32>
    %35 = tpu.matmul %32, %34, %cst_34 {dimension_numbers = #tpu.dot_dimension_numbers<[1], [0], [0], [1], [0, 0, 1, 1], [], []>} : vector<24x42xf32>, vector<42x42xf32>, vector<24x42xf32> -> vector<24x42xf32>
    %36 = arith.addf %31, %35 : vector<24x42xf32>
    %c3 = arith.constant 3 : index
    %c0_35 = arith.constant 0 : index
    %37 = vector.load %arg11[%c3, %c0_35] : memref<32x42xf32, #tpu.memory_space<vmem>>, vector<24x42xf32>
    %c3_36 = arith.constant 3 : index
    %c0_37 = arith.constant 0 : index
    %c0_38 = arith.constant 0 : index
    %38 = vector.load %arg3[%c3_36, %c0_37, %c0_38] : memref<5x42x42xf32, #tpu.memory_space<vmem>>, vector<1x42x42xf32>
    %39 = vector.shape_cast %38 : vector<1x42x42xf32> to vector<42x42xf32>
    %cst_39 = arith.constant dense<0.000000e+00> : vector<24x42xf32>
    %40 = tpu.matmul %37, %39, %cst_39 {dimension_numbers = #tpu.dot_dimension_numbers<[1], [0], [0], [1], [0, 0, 1, 1], [], []>} : vector<24x42xf32>, vector<42x42xf32>, vector<24x42xf32> -> vector<24x42xf32>
    %41 = arith.addf %36, %40 : vector<24x42xf32>
    %c4 = arith.constant 4 : index
    %c0_40 = arith.constant 0 : index
    %42 = vector.load %arg11[%c4, %c0_40] : memref<32x42xf32, #tpu.memory_space<vmem>>, vector<24x42xf32>
    %c4_41 = arith.constant 4 : index
    %c0_42 = arith.constant 0 : index
    %c0_43 = arith.constant 0 : index
    %43 = vector.load %arg3[%c4_41, %c0_42, %c0_43] : memref<5x42x42xf32, #tpu.memory_space<vmem>>, vector<1x42x42xf32>
    %44 = vector.shape_cast %43 : vector<1x42x42xf32> to vector<42x42xf32>
    %cst_44 = arith.constant dense<0.000000e+00> : vector<24x42xf32>
    %45 = tpu.matmul %42, %44, %cst_44 {dimension_numbers = #tpu.dot_dimension_numbers<[1], [0], [0], [1], [0, 0, 1, 1], [], []>} : vector<24x42xf32>, vector<42x42xf32>, vector<24x42xf32> -> vector<24x42xf32>
    %46 = arith.addf %41, %45 : vector<24x42xf32>
    %c0_45 = arith.constant 0 : index
    %c0_46 = arith.constant 0 : index
    %47 = vector.load %arg12[%c0_45, %c0_46] : memref<32x42xf32, #tpu.memory_space<vmem>>, vector<24x42xf32>
    %c0_47 = arith.constant 0 : index
    %c0_48 = arith.constant 0 : index
    %c0_49 = arith.constant 0 : index
    %48 = vector.load %arg4[%c0_47, %c0_48, %c0_49] : memref<3x42x42xf32, #tpu.memory_space<vmem>>, vector<1x42x42xf32>
    %49 = vector.shape_cast %48 : vector<1x42x42xf32> to vector<42x42xf32>
    %cst_50 = arith.constant dense<0.000000e+00> : vector<24x42xf32>
    %50 = tpu.matmul %47, %49, %cst_50 {dimension_numbers = #tpu.dot_dimension_numbers<[1], [0], [0], [1], [0, 0, 1, 1], [], []>} : vector<24x42xf32>, vector<42x42xf32>, vector<24x42xf32> -> vector<24x42xf32>
    %51 = arith.addf %46, %50 : vector<24x42xf32>
    %c1_51 = arith.constant 1 : index
    %c0_52 = arith.constant 0 : index
    %52 = vector.load %arg12[%c1_51, %c0_52] : memref<32x42xf32, #tpu.memory_space<vmem>>, vector<24x42xf32>
    %c1_53 = arith.constant 1 : index
    %c0_54 = arith.constant 0 : index
    %c0_55 = arith.constant 0 : index
    %53 = vector.load %arg4[%c1_53, %c0_54, %c0_55] : memref<3x42x42xf32, #tpu.memory_space<vmem>>, vector<1x42x42xf32>
    %54 = vector.shape_cast %53 : vector<1x42x42xf32> to vector<42x42xf32>
    %cst_56 = arith.constant dense<0.000000e+00> : vector<24x42xf32>
    %55 = tpu.matmul %52, %54, %cst_56 {dimension_numbers = #tpu.dot_dimension_numbers<[1], [0], [0], [1], [0, 0, 1, 1], [], []>} : vector<24x42xf32>, vector<42x42xf32>, vector<24x42xf32> -> vector<24x42xf32>
    %56 = arith.addf %51, %55 : vector<24x42xf32>
    %c2_57 = arith.constant 2 : index
    %c0_58 = arith.constant 0 : index
    %57 = vector.load %arg12[%c2_57, %c0_58] : memref<32x42xf32, #tpu.memory_space<vmem>>, vector<24x42xf32>
    %c2_59 = arith.constant 2 : index
    %c0_60 = arith.constant 0 : index
    %c0_61 = arith.constant 0 : index
    %58 = vector.load %arg4[%c2_59, %c0_60, %c0_61] : memref<3x42x42xf32, #tpu.memory_space<vmem>>, vector<1x42x42xf32>
    %59 = vector.shape_cast %58 : vector<1x42x42xf32> to vector<42x42xf32>
    %cst_62 = arith.constant dense<0.000000e+00> : vector<24x42xf32>
    %60 = tpu.matmul %57, %59, %cst_62 {dimension_numbers = #tpu.dot_dimension_numbers<[1], [0], [0], [1], [0, 0, 1, 1], [], []>} : vector<24x42xf32>, vector<42x42xf32>, vector<24x42xf32> -> vector<24x42xf32>
    %61 = arith.addf %56, %60 : vector<24x42xf32>
    %c0_63 = arith.constant 0 : index
    %c0_64 = arith.constant 0 : index
    %62 = vector.load %arg5[%c0_63, %c0_64] : memref<1x42xf32, #tpu.memory_space<vmem>>, vector<1x42xf32>
    %63 = vector.broadcast %62 : vector<1x42xf32> to vector<24x42xf32>
    %64 = arith.addf %61, %63 : vector<24x42xf32>
    %cst_65 = arith.constant 0.000000e+00 : f32
    %65 = vector.broadcast %cst_65 : f32 to vector<24x42xf32>
    %66 = arith.cmpf ogt, %64, %65 : vector<24x42xf32>
    %cst_66 = arith.constant 0.00999999977 : f32
    %67 = vector.broadcast %cst_66 : f32 to vector<24x42xf32>
    %68 = arith.mulf %67, %64 : vector<24x42xf32>
    %69 = arith.select %66, %64, %68 : vector<24x42xi1>, vector<24x42xf32>
    %70 = tpu.iota {dimensions = array<i32: 1>} : vector<1x42xi32>
    %71 = vector.extract_strided_slice %69 {offsets = [0, 0], sizes = [6, 42], strides = [1, 1]} : vector<24x42xf32> to vector<6x42xf32>
    %72 = vector.extract_strided_slice %71 {offsets = [0, 0], sizes = [5, 42], strides = [1, 1]} : vector<6x42xf32> to vector<5x42xf32>
    %cst_67 = arith.constant dense<0xFF800000> : vector<42xf32>
    %73 = vector.multi_reduction <maximumf>, %72, %cst_67 [0] : vector<5x42xf32> to vector<42xf32>
    %74 = vector.shape_cast %73 : vector<42xf32> to vector<1x42xf32>
    %75 = vector.extract_strided_slice %71 {offsets = [5, 0], sizes = [1, 42], strides = [1, 1]} : vector<6x42xf32> to vector<1x42xf32>
    %76 = arith.maximumf %74, %75 : vector<1x42xf32>
    %c28_i32 = arith.constant 28 : i32
    %77 = vector.broadcast %c28_i32 : i32 to vector<1x42xi32>
    %78 = arith.cmpi sge, %70, %77 : vector<1x42xi32>
    %79 = arith.select %78, %76, %74 : vector<1x42xi1>, vector<1x42xf32>
    %80 = vector.extract_strided_slice %69 {offsets = [16, 0], sizes = [6, 42], strides = [1, 1]} : vector<24x42xf32> to vector<6x42xf32>
    %81 = vector.extract_strided_slice %80 {offsets = [0, 0], sizes = [5, 42], strides = [1, 1]} : vector<6x42xf32> to vector<5x42xf32>
    %cst_68 = arith.constant dense<0xFF800000> : vector<42xf32>
    %82 = vector.multi_reduction <maximumf>, %81, %cst_68 [0] : vector<5x42xf32> to vector<42xf32>
    %83 = vector.shape_cast %82 : vector<42xf32> to vector<1x42xf32>
    %84 = vector.extract_strided_slice %80 {offsets = [5, 0], sizes = [1, 42], strides = [1, 1]} : vector<6x42xf32> to vector<1x42xf32>
    %85 = arith.maximumf %83, %84 : vector<1x42xf32>
    %c28_i32_69 = arith.constant 28 : i32
    %86 = vector.broadcast %c28_i32_69 : i32 to vector<1x42xi32>
    %87 = arith.cmpi sge, %70, %86 : vector<1x42xi32>
    %88 = arith.select %87, %85, %83 : vector<1x42xi1>, vector<1x42xf32>
    %89 = tpu.concatenate %79, %88 in 0 : vector<1x42xf32>, vector<1x42xf32> -> vector<2x42xf32>
    %c0_70 = arith.constant 0 : index
    %c0_71 = arith.constant 0 : index
    %90 = vector.load %arg6[%c0_70, %c0_71] : memref<42x42xf32, #tpu.memory_space<vmem>>, vector<42x42xf32>
    %cst_72 = arith.constant dense<0.000000e+00> : vector<2x42xf32>
    %91 = tpu.matmul %89, %90, %cst_72 {dimension_numbers = #tpu.dot_dimension_numbers<[1], [0], [0], [1], [0, 0, 1, 1], [], []>} : vector<2x42xf32>, vector<42x42xf32>, vector<2x42xf32> -> vector<2x42xf32>
    %c0_73 = arith.constant 0 : index
    %c0_74 = arith.constant 0 : index
    %92 = vector.load %arg9[%c0_73, %c0_74] : memref<2x42xf32, #tpu.memory_space<vmem>>, vector<2x42xf32>
    tpu.vector_store %arg9[%c0_73, %c0_74], %91 {strides = array<i32>} : memref<2x42xf32, #tpu.memory_space<vmem>>, vector<2x42xf32>,
    %c0_75 = arith.constant 0 : index
    %c0_76 = arith.constant 0 : index
    %93 = vector.load %arg7[%c0_75, %c0_76] : memref<42x64xf32, #tpu.memory_space<vmem>>, vector<42x64xf32>
    %cst_77 = arith.constant dense<0.000000e+00> : vector<2x64xf32>
    %94 = tpu.matmul %89, %93, %cst_77 {dimension_numbers = #tpu.dot_dimension_numbers<[1], [0], [0], [1], [0, 0, 1, 1], [], []>} : vector<2x42xf32>, vector<42x64xf32>, vector<2x64xf32> -> vector<2x64xf32>
    %c0_78 = arith.constant 0 : index
    %c0_79 = arith.constant 0 : index
    %95 = vector.load %arg8[%c0_78, %c0_79] : memref<1x64xf32, #tpu.memory_space<vmem>>, vector<1x64xf32>
    %96 = vector.broadcast %95 : vector<1x64xf32> to vector<2x64xf32>
    %97 = arith.addf %94, %96 : vector<2x64xf32>
    %c0_80 = arith.constant 0 : index
    %c0_81 = arith.constant 0 : index
    %98 = vector.load %arg10[%c0_80, %c0_81] : memref<2x64xf32, #tpu.memory_space<vmem>>, vector<2x64xf32>
    tpu.vector_store %arg10[%c0_80, %c0_81], %97 {strides = array<i32>} : memref<2x64xf32, #tpu.memory_space<vmem>>, vector<2x64xf32>,
    return
  }
}

</mosaic_0001>

<bundles_post_ra>
// kernel: generator2_forward.1
= control target key start
LH: loop header
LB: loop body
LE: loop exit
PB: predicated region body
PF: predicated region fallthrough
CT: control target
= control target key end

     0   :  { %16 = vsyncpa [#allocation5], 0  ;;  %vm53_vm0 = vcmask 343040   ;;  %vm66_vm1 = vcmask 1041408   ;;  %s2268_s0 = inlined_call_operand.vmem [shape: f32[32,42], index: 0, kind: input, shape index: {}]   ;;  %s2269_s1 = inlined_call_operand.vmem [shape: f32[42,42], index: 1, kind: input, shape index: {}]   ;;  %s2270_s2 = inlined_call_operand.vmem [shape: f32[1,42], index: 2, kind: input, shape index: {}]   ;;  %s2271_s3 = inlined_call_operand.vmem [shape: f32[5,42,42], index: 3, kind: input, shape index: {}]   ;;  %s2272_s4 = inlined_call_operand.vmem [shape: f32[3,42,42], index: 4, kind: input, shape index: {}]   ;;  %s2273_s5 = inlined_call_operand.vmem [shape: f32[1,42], index: 5, kind: input, shape index: {}]   ;;  %s2274_s6 = inlined_call_operand.vmem [shape: f32[42,42], index: 6, kind: input, shape index: {}]   ;;  %s2275_s7 = inlined_call_operand.vmem [shape: f32[42,64], index: 7, kind: input, shape index: {}]   ;;  %s2276_s8 = inlined_call_operand.vmem [shape: f32[1,64], index: 8, kind: input, shape index: {}]   ;;  %s2277_s9 = inlined_call_operand.hbm [shape: f32[2,42], index: 9, kind: output, shape index: {0}]   ;;  %s2278_s10 = inlined_call_operand.hbm [shape: f32[2,64], index: 10, kind: output, shape index: {1}]  }
   0x1   :  { %v40_v0 = vld [vmem:[%s2269_s1] sm:$0xff]  ;;  %v41_v1 = vld [vmem:[%s2269_s1 + $0x8] sm:$0xff]  ;;  %v42_v2 = vld [vmem:[%s2269_s1 + $0x10] sm:$0xff] }
   0x2   :  { %v1635_v3 = vpack.c.bf16 %v41_v1, %v40_v0  ;;  %v43_v4 = vld [vmem:[%s2269_s1 + $0x18] sm:$0xff]  ;;  %v44_v6 = vld [vmem:[%s2269_s1 + $0x20] sm:$0xff]  ;;  %v45_v7 = vld [vmem:[%s2269_s1 + $0x28] sm:$0x3] }
   0x3   :  { %v1639_v5 = vpack.c.bf16 %v43_v4, %v42_v2  ;;  %v36_v8 = vld [vmem:[%s2268_s0] sm:$0xff] }
   0x4   :  { %1636 = vmatprep.subr.bf16.mxu0 %v1635_v3  ;;  %1431 = vmatprep.mubr.msk.f32.mxu0 %vm53_vm0, %v36_v8 }
   0x5   :  { %17 = vsyncpa [#allocation7], 0  ;;  %1638 = vmatpush3.bf16.msra.mxu0 %v1635_v3  ;;  %v1643_v9 = vpack.c.bf16 %v45_v7, %v44_v6  ;;  %vm1803_vm2 = vmmov 1   ;;  %v37_v11 = vld [vmem:[%s2268_s0 + $0x8] sm:$0xff]  ;;  %v38_v12 = vld [vmem:[%s2268_s0 + $0x10] sm:$0xff]  ;;  %v1804_v14 = vmov 0.0  }
   0x6   :  { %1640 = vmatprep.subr.bf16.mxu0 %v1639_v5  ;;  %vm1886_vm3 = vmpackc.low %vm66_vm1, %vm1803_vm2  ;;  %v39_v13 = vld [vmem:[%s2268_s0 + $0x18] sm:$0xff]  ;;  %173 = vst.msk [vmem:[#allocation3 + $0x10] sm:$0xff] %vm53_vm0, %v1804_v14  ;;  %v1249_v15 = vld [vmem:[%s2271_s3 + $0x30] sm:$0xff]  ;;  %v1805_v20 = vmov 0.0|0.0   ;;  %vm1806_vm4 = vmmov 0   ;;  %vm176_vm8 = vcmask 342016  }
   0x7   :  { %167 = vst.msk [vmem:[#allocation2] sm:$0xff] %vm53_vm0, %v1804_v14  ;;  %168 = vst.msk [vmem:[#allocation2 + $0x8] sm:$0xff] %vm53_vm0, %v1804_v14  ;;  %v1250_v16 = vld [vmem:[%s2271_s3 + $0x38] sm:$0xff]  ;;  %v183_v17 = vld [vmem:[%s2271_s3] sm:$0xff]  ;;  %1649 = vmatprep.subr.bf16.mxu1 %v1805_v20  ;;  %1449 = vmatprep.mubr.msk.f32.mxu1 %vm1806_vm4, %v1804_v14  ;;  %vm1015_vm11 = vcmask 339968   ;;  %vm1041_vm14 = vcmask 1040384  }
   0x8   :  { %169 = vst.msk [vmem:[#allocation2 + $0x10] sm:$0xff] %vm53_vm0, %v1804_v14  ;;  %170 = vst.msk [vmem:[#allocation2 + $0x18] sm:$0xff] %vm53_vm0, %v1804_v14  ;;  %v1650_v18 = vpack.c.bf16 %v1250_v16, %v1249_v15  ;;  %v184_v19 = vld [vmem:[%s2271_s3 + $0x8] sm:$0xff]  ;;  %v1251_v22 = vld [vmem:[%s2271_s3 + $0x40] sm:$0xff]  ;;  %vm1125_vm15 = vcmask 336896   ;;  %s1808_s16 = smov [#allocation6]  }
   0x9   :  { %1642 = vmatpush3.bf16.msra.mxu0 %v1639_v5  ;;  %171 = vst.msk [vmem:[#allocation3] sm:$0xff] %vm53_vm0, %v1804_v14  ;;  %172 = vst.msk [vmem:[#allocation3 + $0x8] sm:$0xff] %vm53_vm0, %v1804_v14  ;;  %v1660_v21 = vpack.c.bf16 %v184_v19, %v183_v17  ;;  %v1252_v23 = vld [vmem:[%s2271_s3 + $0x48] sm:$0xff]  ;;  %v185_v24 = vld [vmem:[%s2271_s3 + $0x10] sm:$0xff]  ;;  %s1231_s17 = sshll.u32 %s1808_s16, 4  ;;  %vm1213_vm1 = vcmask 517120   ;;  %s1232_s17 = int_to_ptr.vmem [resolvable:$true] %s1231_s17 }
   0xa   :  { %1645 = vmatprep.subr.msk.bf16.mxu0 %vm1886_vm3, %v1643_v9  ;;  %174 = vst.msk [vmem:[#allocation3 + $0x18] sm:$0xff] %vm53_vm0, %v1804_v14  ;;  %1651 = vmatpush3.bf16.msra.mxu1 %v1650_v18  ;;  %v1653_v25 = vpack.c.bf16 %v1252_v23, %v1251_v22  ;;  %v186_v26 = vld [vmem:[%s2271_s3 + $0x18] sm:$0xff]  ;;  %v1253_v28 = vld [vmem:[%s2271_s3 + $0x50] sm:$0xff]  ;;  %v187_v30 = vld [vmem:[%s2271_s3 + $0x20] sm:$0xff] }
   0xb   :  { %1652 = vmatprep.subr.bf16.mxu1 %v1805_v20  ;;  %v1663_v27 = vpack.c.bf16 %v186_v26, %v185_v24  ;;  %v1254_v29 = vld [vmem:[%s2271_s3 + $0x58] sm:$0x3]  ;;  %v188_v32 = vld [vmem:[%s2271_s3 + $0x28] sm:$0x3]  ;;  %v1243_v34 = vld [vmem:[%s2270_s2] ss:$0 sm:$0xff] }
   0xc   :  { %v1656_v31 = vpack.c.bf16 %v1254_v29, %v1253_v28  ;;  %v1666_v33 = vpack.c.bf16 %v188_v32, %v187_v30  ;;  %v1263_v51 = vld [vmem:[%s2271_s3 + $0x60] sm:$0xff]  ;;  %v1264_v52 = vld [vmem:[%s2271_s3 + $0x68] sm:$0xff]  ;;  %v1273_v53 = vld [vmem:[%s2271_s3 + $0x90] sm:$0xff] }
   0xd   :  { %1648 = vmatpush3.bf16.msk.msra.mxu0 %vm1886_vm3, %v1643_v9  ;;  %v1274_v54 = vld [vmem:[%s2271_s3 + $0x98] sm:$0xff]  ;;  %v1670_v55 = vpack.c.bf16 %v1264_v52, %v1263_v51  ;;  %v1265_v57 = vld [vmem:[%s2271_s3 + $0x70] sm:$0xff]  ;;  %v1275_v59 = vld [vmem:[%s2271_s3 + $0xa0] sm:$0xff] }
   0xe   :  { %1659 = vmatprep.subr.bf16.mxu0 %v1805_v20  ;;  %1654 = vmatpush3.bf16.msra.mxu1 %v1653_v25  ;;  %v1680_v56 = vpack.c.bf16 %v1274_v54, %v1273_v53  ;;  %v1266_v58 = vld [vmem:[%s2271_s3 + $0x78] sm:$0xff]  ;;  %v1276_v60 = vld [vmem:[%s2271_s3 + $0xa8] sm:$0xff]  ;;  %v1267_v3 = vld [vmem:[%s2271_s3 + $0x80] sm:$0xff] }
   0xf   :  { %1655 = vmatprep.subr.bf16.mxu1 %v1805_v20  ;;  %v190_v63 = vld [vmem:[#allocation2 + $0x9] sm:$0xff]  ;;  %v1673_v1 = vpack.c.bf16 %v1266_v58, %v1265_v57  ;;  %v1683_v2 = vpack.c.bf16 %v1276_v60, %v1275_v59  ;;  %v1278_v6 = vld [vmem:[%s2271_s3 + $0xb8] sm:$0x3]  ;;  %v1283_v9 = vld [vmem:[%s2271_s3 + $0xc0] sm:$0xff] }
  0x10   :  { %1432 = vmatmul.mubr.msk.f32.vlgmr.msra.gmra.mrb[0].mxu0 %vm53_vm0, %v37_v11  ;;  %v181_v0 = vld [vmem:[#allocation2 + $0x8] sm:$0xff]  ;;  %v1277_v5 = vld [vmem:[%s2271_s3 + $0xb0] sm:$0xff]  ;;  %v696_v23 = vld [vmem:[%s2272_s4 + $0x18] sm:$0xff] }
  0x11   :  { %1434 = vmatprep.mubr.msk.f32.mxu0 %vm53_vm0, %v38_v12  ;;  %1661 = vmatpush3.bf16.msra.mxu0 %v1660_v21  ;;  %v1268_v4 = vld [vmem:[%s2271_s3 + $0x88] sm:$0x3]  ;;  %v1686_v8 = vpack.c.bf16 %v1278_v6, %v1277_v5  ;;  %v693_v12 = vld [vmem:[%s2272_s4] sm:$0xff]  ;;  %v1285_v19 = vld [vmem:[%s2271_s3 + $0xd0] sm:$0xff] }
  0x12   :  { %1662 = vmatprep.subr.bf16.mxu0 %v1805_v20  ;;  %1658 = vmatpush3.bf16.msk.msra.mxu1 %vm1886_vm3, %v1656_v31  ;;  %v1676_v7 = vpack.c.bf16 %v1268_v4, %v1267_v3  ;;  %v1284_v11 = vld [vmem:[%s2271_s3 + $0xc8] sm:$0xff]  ;;  %v1286_v21 = vld [vmem:[%s2271_s3 + $0xd8] sm:$0xff]  ;;  %v695_v22 = vld [vmem:[%s2272_s4 + $0x10] sm:$0xff] }
  0x13   :  { %1669 = vmatprep.subr.bf16.mxu1 %v1805_v20  ;;  %v1690_v17 = vpack.c.bf16 %v1284_v11, %v1283_v9  ;;  %v1693_v26 = vpack.c.bf16 %v1286_v21, %v1285_v19  ;;  %v1287_v28 = vld [vmem:[%s2271_s3 + $0xe0] sm:$0xff]  ;;  %v1288_v29 = vld [vmem:[%s2271_s3 + $0xe8] sm:$0x3]  ;;  %v1301_v53 = vld [vmem:[%s2272_s4 + $0x50] sm:$0xff] }
  0x14   :  { %1435 = vmatmul.mubr.msk.f32.gmra.mrb[2].mxu0 %vm53_vm0, %v39_v13  ;;  %v694_v13 = vld [vmem:[%s2272_s4 + $0x8] sm:$0xff]  ;;  %v697_v30 = vld [vmem:[%s2272_s4 + $0x20] sm:$0xff]  ;;  %v1302_v54 = vld [vmem:[%s2272_s4 + $0x58] sm:$0x3] }
  0x15   :  { %1664 = vmatpush3.bf16.msra.mxu0 %v1663_v27  ;;  %1470 = vmatprep.mubr.msk.f32.mxu0 %vm1806_vm4, %v1804_v14  ;;  %v1700_v18 = vpack.c.bf16 %v694_v13, %v693_v12  ;;  %v1703_v27 = vpack.c.bf16 %v696_v23, %v695_v22  ;;  %v698_v31 = vld [vmem:[%s2272_s4 + $0x28] sm:$0x3]  ;;  %v1716_v58 = vpack.c.bf16 %v1302_v54, %v1301_v53  ;;  %v1127_v4 = vld [vmem:[%s2275_s7] sm:$0xff]  ;;  %v1130_v11 = vld [vmem:[%s2275_s7 + $0x18] sm:$0xff] }
  0x16   :  { %1665 = vmatprep.subr.bf16.mxu0 %v1805_v20  ;;  %v1128_v5 = vld [vmem:[%s2275_s7 + $0x8] sm:$0xff]  ;;  %v1043_v6 = vld [vmem:[%s2274_s6] sm:$0xff]  ;;  %v1045_v12 = vld [vmem:[%s2274_s6 + $0x10] sm:$0xff] }
  0x17   :  { %v1047_v19 = vld [vmem:[%s2274_s6 + $0x20] sm:$0xff]  ;;  %v1048_v22 = vld [vmem:[%s2274_s6 + $0x28] sm:$0x3] }
  0x18   :  { %v1736_v23 = vpack.c.bf16 %v1048_v22, %v1047_v19 }
  0x19   :  { %1668 = vmatpush3.bf16.msk.msra.mxu0 %vm1886_vm3, %v1666_v33 }
  0x1a   :  { %1679 = vmatprep.subr.bf16.mxu0 %v1805_v20 }
  0xe3   :  { %v1433_v35 = vpop.f32.mrb[0].mxu0 }
  0xe4   :  { %v142_v36 = vadd.f32 %v1433_v35, %v1243_v34  ;;  %v136_v37 = vpop.f32.mrb[1].mxu0  ;;  %v1706_v35 = vpack.c.bf16 %v698_v31, %v697_v30 }
  0xe5   :  { %v137_v38 = vadd.f32 %v1243_v34, %v136_v37  ;;  %v1298_v37 = vld [vmem:[%s2272_s4 + $0x38] sm:$0xff] }
  0xe6   :  { %vm156_vm5 = vcmp.gt.f32.partialorder %v142_v36, 0.0  ;;  %v160_v39 = vmul.f32 0.01, %v142_v36 }
  0xe7   :  { %vm155_vm6 = vcmp.gt.f32.partialorder %v137_v38, 0.0  ;;  %v159_v40 = vmul.f32 0.01, %v137_v38  ;;  %v1436_v41 = vpop.f32.mrb[2].mxu0 }
  0xe8   :  { %v164_v42 = vsel %vm156_vm5, %v142_v36, %v160_v39  ;;  %v152_v43 = vadd.f32 %v1436_v41, %v1243_v34  ;;  %v146_v44 = vpop.f32.mrb[3].mxu0  ;;  %v1297_v36 = vld [vmem:[%s2272_s4 + $0x30] sm:$0xff]  ;;  %v1308_v39 = vld [vmem:[%s2272_s4 + $0x68] sm:$0xff] }
  0xe9   :  { %178 = vst.msk [vmem:[#allocation3 + $0x10] sm:$0xff] %vm53_vm0, %v164_v42  ;;  %v163_v45 = vsel %vm155_vm6, %v137_v38, %v159_v40  ;;  %v147_v46 = vadd.f32 %v1243_v34, %v146_v44  ;;  %v1696_v34 = vpack.c.bf16 %v1288_v29, %v1287_v28  ;;  %v1307_v38 = vld [vmem:[%s2272_s4 + $0x60] sm:$0xff]  ;;  %v1710_v42 = vpack.c.bf16 %v1298_v37, %v1297_v36 }
  0xea   :  { %175 = vst.msk [vmem:[#allocation3] sm:$0xff] %vm53_vm0, %v163_v45  ;;  %vm158_vm7 = vcmp.gt.f32.partialorder %v152_v43, 0.0  ;;  %v162_v47 = vmul.f32 0.01, %v152_v43  ;;  %v1299_v44 = vld [vmem:[%s2272_s4 + $0x40] sm:$0xff]  ;;  %v1300_v45 = vld [vmem:[%s2272_s4 + $0x48] sm:$0xff] }
  0xeb   :  { %vm157_vm9 = vcmp.gt.f32.partialorder %v147_v46, 0.0  ;;  %v161_v48 = vmul.f32 0.01, %v147_v46  ;;  %v1713_v51 = vpack.c.bf16 %v1300_v45, %v1299_v44 }
  0xec   :  { %v166_v49 = vsel %vm158_vm7, %v152_v43, %v162_v47  ;;  %v1720_v43 = vpack.c.bf16 %v1308_v39, %v1307_v38  ;;  %v1310_v47 = vld [vmem:[%s2272_s4 + $0x78] sm:$0xff] }
  0xed   :  { %179 = vst.msk [vmem:[#allocation2 + $0x11] sm:$0x7f] %vm176_vm8, %v166_v49  ;;  %v165_v50 = vsel %vm157_vm9, %v147_v46, %v161_v48  ;;  %v1309_v46 = vld [vmem:[%s2272_s4 + $0x70] sm:$0xff] }
  0xee   :  { %177 = vst.msk [vmem:[#allocation2 + $0x1] sm:$0x7f] %vm176_vm8, %v165_v50  ;;  %v691_v50 = vld [vmem:[#allocation3 + $0x8] sm:$0xff]  ;;  %v1723_v52 = vpack.c.bf16 %v1310_v47, %v1309_v46 }
  0xf0   :  { %v897_v3 = vld [vmem:[#allocation3 + $0x12] sm:$0xff] }
  0xf1   :  { %v690_v49 = vld [vmem:[#allocation3] sm:$0xff] }
  0xf4   :  { %v191_v15 = vld [vmem:[#allocation2 + $0x11] sm:$0xff] }
  0xf5   :  { %v189_v61 = vld [vmem:[#allocation2 + $0x1] sm:$0xff]  ;;  %v182_v16 = vld [vmem:[#allocation2 + $0x10] sm:$0xff] }
  0xf6   :  { %v180_v62 = vld [vmem:[#allocation2] sm:$0xff]  ;;  %1450 = vmatmul.mubr.msk.f32.vlgmr.msra.gmra.mrb[0].mxu1 %vm53_vm0, %v189_v61  ;;  %v382_v32 = vld [vmem:[#allocation2 + $0xa] sm:$0xff]  ;;  %v383_v40 = vld [vmem:[#allocation2 + $0x12] sm:$0xff] }
  0xf7   :  { %1471 = vmatmul.mubr.msk.f32.vlgmr.msra.gmra.mrb[4].mxu0 %vm53_vm0, %v180_v62  ;;  %1671 = vmatpush3.bf16.msra.mxu1 %v1670_v55  ;;  %v381_v24 = vld [vmem:[#allocation2 + $0x2] sm:$0xff]  ;;  %v485_v33 = vld [vmem:[#allocation2 + $0xb] sm:$0xff]  ;;  %v486_v41 = vld [vmem:[#allocation2 + $0x13] sm:$0xff] }
  0xf8   :  { %1681 = vmatpush3.bf16.msra.mxu0 %v1680_v56  ;;  %1452 = vmatprep.mubr.msk.f32.mxu1 %vm1806_vm4, %v1804_v14  ;;  %v484_v25 = vld [vmem:[#allocation2 + $0x3] sm:$0xff]  ;;  %v588_v57 = vld [vmem:[#allocation2 + $0xc] sm:$0xff]  ;;  %v589_v60 = vld [vmem:[#allocation2 + $0x14] sm:$0xff] }
  0xf9   :  { %1473 = vmatprep.mubr.msk.f32.mxu0 %vm1806_vm4, %v1804_v14  ;;  %1672 = vmatprep.subr.bf16.mxu1 %v1805_v20  ;;  %v587_v48 = vld [vmem:[#allocation2 + $0x4] sm:$0xff]  ;;  %v692_v61 = vld [vmem:[#allocation3 + $0x10] sm:$0xff] }
  0xfa   :  { %1682 = vmatprep.subr.bf16.mxu0 %v1805_v20  ;;  %1453 = vmatmul.mubr.msk.f32.gmra.mrb[2].mxu1 %vm53_vm0, %v190_v63  ;;  %v1311_v55 = vld [vmem:[%s2272_s4 + $0x80] sm:$0xff]  ;;  %v1312_v56 = vld [vmem:[%s2272_s4 + $0x88] sm:$0x3] }
  0xfb   :  { %1474 = vmatmul.mubr.msk.f32.gmra.mrb[6].mxu0 %vm53_vm0, %v181_v0  ;;  %1674 = vmatpush3.bf16.msra.mxu1 %v1673_v1  ;;  %v1726_v59 = vpack.c.bf16 %v1312_v56, %v1311_v55  ;;  %v792_v62 = vld [vmem:[#allocation3 + $0x1] sm:$0xff]  ;;  %v793_v0 = vld [vmem:[#allocation3 + $0x9] sm:$0xff] }
  0xfc   :  { %1684 = vmatpush3.bf16.msra.mxu0 %v1683_v2  ;;  %1455 = vmatprep.mubr.msk.f32.mxu1 %vm1806_vm4, %v1804_v14  ;;  %v895_v63 = vld [vmem:[#allocation3 + $0x2] sm:$0xff]  ;;  %v896_v1 = vld [vmem:[#allocation3 + $0xa] sm:$0xff] }
  0xfd   :  { %1476 = vmatprep.mubr.msk.f32.mxu0 %vm1806_vm4, %v1804_v14  ;;  %1675 = vmatprep.subr.bf16.mxu1 %v1805_v20  ;;  %v794_v2 = vld [vmem:[#allocation3 + $0x11] sm:$0xff] }
  0xfe   :  { %1685 = vmatprep.subr.bf16.mxu0 %v1805_v20  ;;  %1456 = vmatmul.mubr.msk.f32.gmra.mrb[4].mxu1 %vm53_vm0, %v191_v15  ;;  %v1046_v15 = vld [vmem:[%s2274_s6 + $0x18] sm:$0xff] }
  0xff   :  { %1477 = vmatmul.mubr.msk.f32.gmra.mrb[8].mxu0 %vm53_vm0, %v182_v16  ;;  %1678 = vmatpush3.bf16.msk.msra.mxu1 %vm1886_vm3, %v1676_v7  ;;  %v1740_v7 = vpack.c.bf16 %v1128_v5, %v1127_v4  ;;  %v1733_v16 = vpack.c.bf16 %v1046_v15, %v1045_v12 }
 0x100   :  { %1688 = vmatpush3.bf16.msk.msra.mxu0 %vm1886_vm3, %v1686_v8  ;;  %1491 = vmatprep.mubr.msk.f32.mxu1 %vm1806_vm4, %v1804_v14  ;;  %v1044_v8 = vld [vmem:[%s2274_s6 + $0x8] sm:$0xff] }
 0x101   :  { %1512 = vmatprep.mubr.msk.f32.mxu0 %vm1806_vm4, %v1804_v14  ;;  %1689 = vmatprep.subr.bf16.mxu1 %v1805_v20  ;;  %v1730_v9 = vpack.c.bf16 %v1044_v8, %v1043_v6 }
 0x102   :  { %1699 = vmatprep.subr.bf16.mxu0 %v1805_v20  ;;  %1492 = vmatmul.mubr.msk.f32.vlgmr.msra.gmra.mrb[6].mxu1 %vm53_vm0, %v381_v24 }
 0x103   :  { %1513 = vmatmul.mubr.msk.f32.vlgmr.msra.gmra.mrb[10].mxu0 %vm53_vm0, %v484_v25  ;;  %1691 = vmatpush3.bf16.msra.mxu1 %v1690_v17  ;;  %v1131_v17 = vld [vmem:[%s2275_s7 + $0x20] sm:$0xff] }
 0x104   :  { %1701 = vmatpush3.bf16.msra.mxu0 %v1700_v18  ;;  %1494 = vmatprep.mubr.msk.f32.mxu1 %vm1806_vm4, %v1804_v14  ;;  %v1132_v18 = vld [vmem:[%s2275_s7 + $0x28] sm:$0x3] }
 0x105   :  { %1515 = vmatprep.mubr.msk.f32.mxu0 %vm1806_vm4, %v1804_v14  ;;  %1692 = vmatprep.subr.bf16.mxu1 %v1805_v20  ;;  %v1746_v21 = vpack.c.bf16 %v1132_v18, %v1131_v17 }
 0x106   :  { %1702 = vmatprep.subr.bf16.mxu0 %v1805_v20  ;;  %1495 = vmatmul.mubr.msk.f32.gmra.mrb[8].mxu1 %vm53_vm0, %v382_v32 }
 0x107   :  { %1516 = vmatmul.mubr.msk.f32.gmra.mrb[12].mxu0 %vm53_vm0, %v485_v33  ;;  %1694 = vmatpush3.bf16.msra.mxu1 %v1693_v26 }
 0x108   :  { %1704 = vmatpush3.bf16.msra.mxu0 %v1703_v27  ;;  %1497 = vmatprep.mubr.msk.f32.mxu1 %vm1806_vm4, %v1804_v14 }
 0x109   :  { %1518 = vmatprep.mubr.msk.f32.mxu0 %vm1806_vm4, %v1804_v14  ;;  %1695 = vmatprep.subr.bf16.mxu1 %v1805_v20 }
 0x10a   :  { %1705 = vmatprep.subr.bf16.mxu0 %v1805_v20  ;;  %1498 = vmatmul.mubr.msk.f32.gmra.mrb[10].mxu1 %vm53_vm0, %v383_v40 }
 0x10b   :  { %1519 = vmatmul.mubr.msk.f32.gmra.mrb[14].mxu0 %vm53_vm0, %v486_v41  ;;  %1698 = vmatpush3.bf16.msk.msra.mxu1 %vm1886_vm3, %v1696_v34 }
 0x10c   :  { %1708 = vmatpush3.bf16.msk.msra.mxu0 %vm1886_vm3, %v1706_v35  ;;  %1533 = vmatprep.mubr.msk.f32.mxu1 %vm1806_vm4, %v1804_v14 }
 0x10d   :  { %1554 = vmatprep.mubr.msk.f32.mxu0 %vm1806_vm4, %v1804_v14  ;;  %1709 = vmatprep.subr.bf16.mxu1 %v1805_v20 }
 0x10e   :  { %1719 = vmatprep.subr.bf16.mxu0 %v1805_v20  ;;  %1534 = vmatmul.mubr.msk.f32.vlgmr.msra.gmra.mrb[12].mxu1 %vm53_vm0, %v587_v48 }
 0x10f   :  { %1555 = vmatmul.mubr.msk.f32.vlgmr.msra.gmra.mrb[16].mxu0 %vm53_vm0, %v690_v49  ;;  %1711 = vmatpush3.bf16.msra.mxu1 %v1710_v42 }
 0x110   :  { %1721 = vmatpush3.bf16.msra.mxu0 %v1720_v43  ;;  %1536 = vmatprep.mubr.msk.f32.mxu1 %vm1806_vm4, %v1804_v14 }
 0x111   :  { %1557 = vmatprep.mubr.msk.f32.mxu0 %vm1806_vm4, %v1804_v14  ;;  %1712 = vmatprep.subr.bf16.mxu1 %v1805_v20 }
 0x112   :  { %1722 = vmatprep.subr.bf16.mxu0 %v1805_v20  ;;  %1537 = vmatmul.mubr.msk.f32.gmra.mrb[14].mxu1 %vm53_vm0, %v588_v57 }
 0x113   :  { %1558 = vmatmul.mubr.msk.f32.gmra.mrb[18].mxu0 %vm53_vm0, %v691_v50  ;;  %1714 = vmatpush3.bf16.msra.mxu1 %v1713_v51 }
 0x114   :  { %1724 = vmatpush3.bf16.msra.mxu0 %v1723_v52  ;;  %1539 = vmatprep.mubr.msk.f32.mxu1 %vm1806_vm4, %v1804_v14 }
 0x115   :  { %1560 = vmatprep.mubr.msk.f32.mxu0 %vm1806_vm4, %v1804_v14  ;;  %1715 = vmatprep.subr.bf16.mxu1 %v1805_v20 }
 0x116   :  { %1725 = vmatprep.subr.bf16.mxu0 %v1805_v20  ;;  %1540 = vmatmul.mubr.msk.f32.gmra.mrb[16].mxu1 %vm53_vm0, %v589_v60 }
 0x117   :  { %1561 = vmatmul.mubr.msk.f32.gmra.mrb[20].mxu0 %vm53_vm0, %v692_v61  ;;  %1718 = vmatpush3.bf16.msk.msra.mxu1 %vm1886_vm3, %v1716_v58 }
 0x118   :  { %1728 = vmatpush3.bf16.msk.msra.mxu0 %vm1886_vm3, %v1726_v59  ;;  %1575 = vmatprep.mubr.msk.f32.mxu1 %vm1806_vm4, %v1804_v14 }
 0x119   :  { %1596 = vmatprep.mubr.msk.f32.mxu0 %vm1806_vm4, %v1804_v14  ;;  %1739 = vmatprep.subr.bf16.mxu0 %v1805_v20 }
 0x11a   :  { %1729 = vmatprep.subr.bf16.mxu1 %v1805_v20  ;;  %1576 = vmatmul.mubr.msk.f32.vlgmr.msra.gmra.mrb[18].mxu1 %vm53_vm0, %v792_v62 }
 0x11b   :  { %1597 = vmatmul.mubr.msk.f32.vlgmr.msra.gmra.mrb[22].mxu0 %vm53_vm0, %v895_v63  ;;  %1578 = vmatprep.mubr.msk.f32.mxu1 %vm1806_vm4, %v1804_v14 }
 0x11c   :  { %1599 = vmatprep.mubr.msk.f32.mxu0 %vm1806_vm4, %v1804_v14  ;;  %1741 = vmatpush3.bf16.msra.mxu0 %v1740_v7 }
 0x11d   :  { %1731 = vmatpush3.bf16.msra.mxu1 %v1730_v9  ;;  %1742 = vmatprep.subr.bf16.mxu0 %v1805_v20  ;;  %v1317_v9 = vld [vmem:[%s2273_s5] ss:$0 sm:$0xff]  ;;  %s1807_s5 = smov [#allocation4]  }
 0x11e   :  { %1579 = vmatmul.mubr.msk.f32.gmra.mrb[20].mxu1 %vm53_vm0, %v793_v0  ;;  %1732 = vmatprep.subr.bf16.mxu1 %v1805_v20  ;;  %s1221_s15 = sshll.u32 %s1807_s5, 4  ;;  %s1222_s15 = int_to_ptr.vmem [resolvable:$true] %s1221_s15 }
 0x11f   :  { %1600 = vmatmul.mubr.msk.f32.gmra.mrb[24].mxu0 %vm53_vm0, %v896_v1  ;;  %1581 = vmatprep.mubr.msk.f32.mxu1 %vm1806_vm4, %v1804_v14  ;;  %s1755_s18 = scalar_lea.vmem %s1222_s15, 32  ;;  %p1760_p1 = scmp.lt.s32.totalorder %s1222_s15, %s1222_s15 }
 0x120   :  { %1602 = vmatprep.mubr.msk.f32.mxu0 %vm1806_vm4, %v1804_v14  ;;  %p1756_p0 = scmp.ne.s32.totalorder %s1222_s15, %s1755_s18  ;;  %p1761_p2 = scmp.lt.s32.totalorder %s1755_s18, %s1755_s18 }
 0x121   :  { %1734 = vmatpush3.bf16.msra.mxu1 %v1733_v16 }
 0x122   :  { %1582 = vmatmul.mubr.msk.f32.gmra.mrb[22].mxu1 %vm53_vm0, %v794_v2  ;;  %1735 = vmatprep.subr.bf16.mxu1 %v1805_v20  ;;  %p1762_p3 = por %p1761_p2, %p1760_p1 }
 0x123   :  { %1603 = vmatmul.mubr.msk.f32.gmra.mrb[26].mxu0 %vm53_vm0, %v897_v3  ;;  %1617 = vmatprep.mubr.msk.f32.mxu1 %vm1806_vm4, %v1804_v14 }
 0x124   :  { %1632 = vmatprep.mubr.msk.f32.mxu0 %vm1806_vm4, %v1804_v14  ;;  %v1129_v14 = vld [vmem:[%s2275_s7 + $0x10] sm:$0xff]  ;;  %p1763_p4 = pnand %p1762_p3, %p1756_p0 }
 0x125   :  { %v1743_v13 = vpack.c.bf16 %v1130_v11, %v1129_v14  ;;  %1738 = vmatpush3.bf16.msk.msra.mxu1 %vm1886_vm3, %v1736_v23 }
 0x127   :  { %1744 = vmatpush3.bf16.msra.mxu0 %v1743_v13 }
 0x128   :  { %1745 = vmatprep.subr.bf16.mxu0 %v1805_v20 }
 0x12b   :  { %1748 = vmatpush3.bf16.msk.msra.mxu0 %vm1886_vm3, %v1746_v21 }
 0x1c9   :  { %v277_v24 = vpop.f32.mrb[0].mxu1 }
 0x1ca   :  { %v368_v25 = vpop.f32.mrb[4].mxu0  ;;  %v1451_v27 = vpop.f32.mrb[1].mxu1 }
 0x1cb   :  { %v369_v26 = vadd.f32 %v368_v25, %v277_v24  ;;  %v1472_v28 = vpop.f32.mrb[5].mxu0 }
 0x1cd   :  { %v282_v29 = vpop.f32.mrb[2].mxu1 }
 0x1ce   :  { %v373_v30 = vpop.f32.mrb[6].mxu0  ;;  %v1454_v31 = vpop.f32.mrb[3].mxu1 }
 0x1cf   :  { %v1475_v32 = vpop.f32.mrb[7].mxu0 }
 0x1d1   :  { %v286_v33 = vpop.f32.mrb[4].mxu1 }
 0x1d2   :  { %v377_v34 = vpop.f32.mrb[8].mxu0  ;;  %v1457_v20 = vpop.f32.mrb[5].mxu1 }
 0x1d3   :  { %v378_v35 = vadd.f32 %v377_v34, %v286_v33  ;;  %v1478_v36 = vpop.f32.mrb[9].mxu0 }
 0x1d4   :  { %v1013_v36 = vlaneseq }
 0x1d5   :  { %v469_v37 = vpop.f32.mrb[6].mxu1 }
 0x1d6   :  { %v572_v38 = vpop.f32.mrb[10].mxu0  ;;  %v482_v39 = vadd.f32 %v469_v37, %v369_v26  ;;  %v1493_v40 = vpop.f32.mrb[7].mxu1 }
 0x1d7   :  { %v1514_v10 = vpop.f32.mrb[11].mxu0  ;;  %v1014_v40 = vand.u32 127, %v1013_v36 }
 0x1d8   :  { %v585_v41 = vadd.f32 %v572_v38, %v482_v39 }
 0x1d9   :  { %v474_v42 = vpop.f32.mrb[8].mxu1  ;;  %vm1024_vm13 = vcmp.ge.s32.totalorder %v1014_v40, 28 }
 0x1da   :  { %v577_v43 = vpop.f32.mrb[12].mxu0  ;;  %v1496_v44 = vpop.f32.mrb[9].mxu1 }
 0x1db   :  { %v1517_v45 = vpop.f32.mrb[13].mxu0 }
 0x1dd   :  { %v478_v46 = vpop.f32.mrb[10].mxu1 }
 0x1de   :  { %v581_v47 = vpop.f32.mrb[14].mxu0  ;;  %v483_v48 = vadd.f32 %v478_v46, %v378_v35  ;;  %v1499_v49 = vpop.f32.mrb[11].mxu1 }
 0x1df   :  { %v1520_v50 = vpop.f32.mrb[15].mxu0 }
 0x1e0   :  { %v586_v51 = vadd.f32 %v581_v47, %v483_v48  ;;  %v1320_v50 = vld [vmem:[%s2276_s8] ss:$0 sm:$0xff] }
 0x1e1   :  { %v675_v52 = vpop.f32.mrb[12].mxu1 }
 0x1e2   :  { %v777_v53 = vpop.f32.mrb[16].mxu0  ;;  %v688_v54 = vadd.f32 %v675_v52, %v585_v41  ;;  %v1535_v55 = vpop.f32.mrb[13].mxu1 }
 0x1e3   :  { %v1556_v56 = vpop.f32.mrb[17].mxu0 }
 0x1e4   :  { %v790_v57 = vadd.f32 %v777_v53, %v688_v54 }
 0x1e5   :  { %v680_v58 = vpop.f32.mrb[14].mxu1 }
 0x1e6   :  { %v782_v59 = vpop.f32.mrb[18].mxu0  ;;  %v1538_v60 = vpop.f32.mrb[15].mxu1 }
 0x1e7   :  { %v1559_v61 = vpop.f32.mrb[19].mxu0 }
 0x1e9   :  { %v684_v62 = vpop.f32.mrb[16].mxu1 }
 0x1ea   :  { %v786_v63 = vpop.f32.mrb[20].mxu0  ;;  %v689_v0 = vadd.f32 %v684_v62, %v586_v51  ;;  %v1541_v1 = vpop.f32.mrb[17].mxu1 }
 0x1eb   :  { %v1562_v2 = vpop.f32.mrb[21].mxu0 }
 0x1ec   :  { %v791_v3 = vadd.f32 %v786_v63, %v689_v0 }
 0x1ed   :  { %v880_v4 = vpop.f32.mrb[18].mxu1 }
 0x1ee   :  { %v983_v5 = vpop.f32.mrb[22].mxu0  ;;  %v893_v6 = vadd.f32 %v880_v4, %v790_v57  ;;  %v1577_v7 = vpop.f32.mrb[19].mxu1 }
 0x1ef   :  { %v1598_v8 = vpop.f32.mrb[23].mxu0 }
 0x1f0   :  { %v996_v14 = vadd.f32 %v983_v5, %v893_v6 }
 0x1f1   :  { %v885_v11 = vpop.f32.mrb[20].mxu1 }
 0x1f2   :  { %v988_v12 = vpop.f32.mrb[24].mxu0  ;;  %v1005_v13 = vadd.f32 %v1317_v9, %v996_v14  ;;  %v1580_v15 = vpop.f32.mrb[21].mxu1 }
 0x1f3   :  { %v1601_v16 = vpop.f32.mrb[25].mxu0 }
 0x1f4   :  { %vm1007_vm10 = vcmp.gt.f32.partialorder %v1005_v13, 0.0  ;;  %v1009_v17 = vmul.f32 0.01, %v1005_v13 }
 0x1f5   :  { %v889_v18 = vpop.f32.mrb[22].mxu1 }
 0x1f6   :  { %v992_v19 = vpop.f32.mrb[26].mxu0  ;;  %v1011_v21 = vsel %vm1007_vm10, %v1005_v13, %v1009_v17  ;;  %v894_v22 = vadd.f32 %v889_v18, %v791_v3  ;;  %v1583_v23 = vpop.f32.mrb[23].mxu1 }
 0x1f7   :  { %v1604_v24 = vpop.f32.mrb[27].mxu0  ;;  %v1016_v25 = vsel %vm1015_vm11, %v1011_v21, -inf }
 0x1f8   :  { %v1017_v26 = vrot.slane %v1016_v25, 4  ;;  %v997_v27 = vadd.f32 %v992_v19, %v894_v22 }
 0x1fa   :  { %v1018_v28 = vmax.f32 %v1016_v25, %v1017_v26  ;;  %v1006_v29 = vadd.f32 %v1317_v9, %v997_v27 }
 0x1fc   :  { %v1019_v30 = vrot.slane %v1018_v28, 2  ;;  %vm1008_vm12 = vcmp.gt.f32.partialorder %v1006_v29, 0.0  ;;  %v1010_v31 = vmul.f32 0.01, %v1006_v29 }
 0x1fe   :  { %v1020_v32 = vmax.f32 %v1018_v28, %v1019_v30  ;;  %v1012_v33 = vsel %vm1008_vm12, %v1006_v29, %v1010_v31 }
 0x1ff   :  { %v1026_v34 = vsel %vm1015_vm11, %v1012_v33, -inf }
 0x200   :  { %v1021_v35 = vrot.slane %v1020_v32, 1  ;;  %v1027_v20 = vrot.slane %v1026_v34, 4 }
 0x202   :  { %v1028_v37 = vmax.f32 %v1026_v34, %v1027_v20  ;;  %v1022_v38 = vmax.f32 %v1020_v32, %v1021_v35 }
 0x204   :  { %v1029_v39 = vrot.slane %v1028_v37, 2  ;;  %v1023_v41 = vmax.f32 %v1022_v38, %v1011_v21 }
 0x206   :  { %v1030_v10 = vmax.f32 %v1028_v37, %v1029_v39  ;;  %v1025_v44 = vsel %vm1024_vm13, %v1023_v41, %v1022_v38 }
 0x207   :  { %v1036_v47 = vrot.slane %v1025_v44, 5 }
 0x208   :  { %v1031_v42 = vrot.slane %v1030_v10, 1 }
 0x20a   :  { %v1032_v43 = vmax.f32 %v1030_v10, %v1031_v42 }
 0x20c   :  { %v1033_v45 = vmax.f32 %v1032_v43, %v1012_v33 }
 0x20e   :  { %v1034_v46 = vsel %vm1024_vm13, %v1033_v45, %v1032_v43 }
 0x20f   :  { %v1039_v48 = vrot.slane %v1034_v46, 4 }
 0x211   :  { %v1042_v49 = vsel %vm1041_vm14, %v1036_v47, %v1039_v48 }
 0x212   :  { %1618 = vmatmul.mubr.msk.f32.vlgmr.msra.gmra.mrb[24].mxu1 %vm53_vm0, %v1042_v49  ;;  %1633 = vmatmul.mubr.msk.f32.vlgmr.msra.gmra.mrb[28].mxu0 %vm53_vm0, %v1042_v49 }
 0x2e5   :  { %v1121_v51 = vpop.f32.mrb[24].mxu1  ;;  %v1209_v52 = vpop.f32.mrb[28].mxu0 }
 0x2e6   :  { %v1210_v53 = vadd.f32 %v1320_v50, %v1209_v52  ;;  %v1619_v54 = vpop.f32.mrb[25].mxu1  ;;  %v1634_v55 = vpop.f32.mrb[29].mxu0  ;;  %1126 = vst.msk [vmem:[#allocation4] sm:$0x3] %vm1125_vm15, %v1121_v51 }
 0x2e7   :  { %1766 = shalt.err (!%p1763_p4)
}
 0x2e8   :  { %s1767_s20 = scalar_lea.hbm %s2277_s9, 32 }
 0x2e9   :  { %p1768_p5 = scmp.ne.s32.totalorder %s2277_s9, %s1767_s20  ;;  %p1771_p6 = scmp.lt.u32.totalorder %s1767_s20, %s2277_s9 }
 0x2eb   :  { %p1773_p7 = pnand %p1771_p6, %p1768_p5 }
 0x2ed   :  { %1776 = shalt.err (!%p1773_p7)
}
 0x2ee   :  { %1224 = dma.vmem_to_hbm [thread:$0]  %s1222_s15, 32, %s2277_s9, [#allocation5]   ;;  %1214 = vst.msk [vmem:[#allocation6] sm:$0x3] %vm1213_vm1, %v1210_v53 }
 0x2ef   :  { %s1777_s1 = scalar_lea.vmem %s1232_s17, 32  ;;  %p1782_p9 = scmp.lt.s32.totalorder %s1232_s17, %s1232_s17 }
 0x2f0   :  { %p1778_p8 = scmp.ne.s32.totalorder %s1232_s17, %s1777_s1  ;;  %p1783_p10 = scmp.lt.s32.totalorder %s1777_s1, %s1777_s1 }
 0x2f2   :  { %p1784_p11 = por %p1783_p10, %p1782_p9 }
 0x2f4   :  { %p1785_p12 = pnand %p1784_p11, %p1778_p8 }
 0x2f6   :  { %1788 = shalt.err (!%p1785_p12)
}
 0x2f7   :  { %s1789_s29 = scalar_lea.hbm %s2278_s10, 32 }
 0x2f8   :  { %p1790_p13 = scmp.ne.s32.totalorder %s2278_s10, %s1789_s29  ;;  %p1793_p0 = scmp.lt.u32.totalorder %s1789_s29, %s2278_s10 }
 0x2fa   :  { %p1795_p1 = pnand %p1793_p0, %p1790_p13 }
 0x2fc   :  { %1798 = shalt.err (!%p1795_p1)
}
 0x2fd   :  { %1234 = dma.vmem_to_hbm [thread:$0]  %s1232_s17, 32, %s2278_s10, [#allocation7]  }
 0x2fe   :  { %1799 = dma.done.wait [#allocation5], 32  }
 0x2ff   :  { %1800 = vsyncadd [#allocation5], 4294967264 }
 0x300   :  { %1801 = dma.done.wait [#allocation7], 32  }
 0x301   :  { %1802 = vsyncadd [#allocation7], 4294967264 }
 0x302   :  { %1241 = vsyncpa [#allocation5], 1 }
 0x303   :  { %1242 = vsyncpa [#allocation7], 1 }

</bundles_post_ra>
